<compile_context>
chip_gen: v7x
topology: tpu7x:2x2x1
jax: 0.10.0
libtpu: 0.0.40
codegen_flags: <defaults>
</compile_context>

<pallas_src>
import jax
import jax.numpy as jnp
from jax.experimental import pallas as pl
from jax.experimental.pallas import tpu as pltpu


_HIGHEST = jax.lax.Precision.HIGHEST


def _gating_kernel(x_ref, y_ref, w_ref, u_ref, bw_ref, bu_ref, o_ref):
    # x_ref, y_ref : [TM, D]  f32 row tiles
    # w_ref        : [3, D, D]  (Wr^T, Wz^T, Wg^T)  -- applied to y
    # u_ref        : [3, D, D]  (Ur^T, Uz^T, Ug^T)  -- applied to x / (r*x)
    # bw_ref       : [3, 1, D]  biases (Wr; Wz with -bg folded in; Wg)
    # bu_ref       : [3, 1, D]  biases (Ur; Uz; Ug)
    # o_ref        : [TM, D]
    x = x_ref[...].astype(jnp.float32)
    y = y_ref[...].astype(jnp.float32)

    wr_y = jnp.dot(y, w_ref[0], preferred_element_type=jnp.float32,
                   precision=_HIGHEST) + bw_ref[0]
    wz_y = jnp.dot(y, w_ref[1], preferred_element_type=jnp.float32,
                   precision=_HIGHEST) + bw_ref[1]
    wg_y = jnp.dot(y, w_ref[2], preferred_element_type=jnp.float32,
                   precision=_HIGHEST) + bw_ref[2]

    ur_x = jnp.dot(x, u_ref[0], preferred_element_type=jnp.float32,
                   precision=_HIGHEST) + bu_ref[0]
    uz_x = jnp.dot(x, u_ref[1], preferred_element_type=jnp.float32,
                   precision=_HIGHEST) + bu_ref[1]

    r = jax.nn.sigmoid(wr_y + ur_x)
    z = jax.nn.sigmoid(wz_y + uz_x)          # (-bg already folded into bw[1])

    ug_rx = jnp.dot(r * x, u_ref[2], preferred_element_type=jnp.float32,
                    precision=_HIGHEST) + bu_ref[2]
    h = jnp.tanh(wg_y + ug_rx)

    o_ref[...] = ((1.0 - z) * x + z * h).astype(o_ref.dtype)


def _round_up(a, b):
    return (a + b - 1) // b * b


def init_gating_params(key, d_input):
    """Deterministic params matching torch.nn.Linear's default init scheme."""
    ks = jax.random.split(key, 12)
    lim = 1.0 / float(d_input) ** 0.5

    def w(k):
        return jax.random.uniform(k, (d_input, d_input), jnp.float32, -lim, lim)

    def b(k):
        return jax.random.uniform(k, (d_input,), jnp.float32, -lim, lim)

    return dict(
        Wr=w(ks[0]), br_w=b(ks[1]), Ur=w(ks[2]), br_u=b(ks[3]),
        Wz=w(ks[4]), bz_w=b(ks[5]), Uz=w(ks[6]), bz_u=b(ks[7]),
        Wg=w(ks[8]), bg_w=b(ks[9]), Ug=w(ks[10]), bg_u=b(ks[11]),
    )


def gating_mechanism(x, y, params, bg=0.1, tile_m=256):
    """x, y: [..., D]. Returns g with the same shape/dtype as x."""
    orig_shape = x.shape
    d = orig_shape[-1]
    xf = x.reshape(-1, d).astype(jnp.float32)
    yf = y.reshape(-1, d).astype(jnp.float32)
    n = xf.shape[0]

    # Stack weights (pre-transposed so kernel does plain [TM,D] @ [D,D]).
    w_stack = jnp.stack([params["Wr"].T, params["Wz"].T, params["Wg"].T])   # [3,D,D]
    u_stack = jnp.stack([params["Ur"].T, params["Uz"].T, params["Ug"].T])   # [3,D,D]
    bw = jnp.stack([params["br_w"],
                    params["bz_w"] - jnp.float32(bg),                       # fold -bg
                    params["bg_w"]])[:, None, :]                            # [3,1,D]
    bu = jnp.stack([params["br_u"], params["bz_u"], params["bg_u"]])[:, None, :]

    # Row tile: multiple of 8 sublanes, capped at tile_m; pad rows to a multiple.
    tm = min(tile_m, _round_up(n, 8))
    n_pad = _round_up(n, tm)
    if n_pad != n:
        pad = n_pad - n
        xf = jnp.pad(xf, ((0, pad), (0, 0)))
        yf = jnp.pad(yf, ((0, pad), (0, 0)))
    grid = (n_pad // tm,)

    # Advisory cost estimate (six [n,d]x[d,d] matmuls, 3 transcendental maps).
    flops = 6 * 2 * n_pad * d * d + 10 * n_pad * d
    transcendentals = 3 * n_pad * d
    bytes_accessed = (3 * n_pad * d + 6 * d * d + 6 * d) * 4

    # VMEM: resident weights + double-buffered x/y/out tiles, with slack.
    vmem_need = (6 * d * d + 3 * 2 * tm * d + 6 * d) * 4 + (4 << 20)
    vmem_limit = int(min(max(vmem_need, 32 << 20), 64 << 20))

    out = pl.pallas_call(
        _gating_kernel,
        out_shape=jax.ShapeDtypeStruct((n_pad, d), x.dtype),
        grid_spec=pltpu.PrefetchScalarGridSpec(
            num_scalar_prefetch=0,
            grid=grid,
            in_specs=[
                pl.BlockSpec((tm, d), lambda i: (i, 0)),        # x rows
                pl.BlockSpec((tm, d), lambda i: (i, 0)),        # y rows
                pl.BlockSpec((3, d, d), lambda i: (0, 0, 0)),   # W stack (resident)
                pl.BlockSpec((3, d, d), lambda i: (0, 0, 0)),   # U stack (resident)
                pl.BlockSpec((3, 1, d), lambda i: (0, 0, 0)),   # W biases
                pl.BlockSpec((3, 1, d), lambda i: (0, 0, 0)),   # U biases
            ],
            out_specs=pl.BlockSpec((tm, d), lambda i: (i, 0)),
        ),
        compiler_params=pltpu.CompilerParams(
            dimension_semantics=("parallel",),
            vmem_limit_bytes=vmem_limit,
        ),
        cost_estimate=pl.CostEstimate(
            flops=flops,
            transcendentals=transcendentals,
            bytes_accessed=bytes_accessed,
        ),
    )(xf, yf, w_stack, u_stack, bw, bu)

    return out[:n].reshape(orig_shape).astype(x.dtype)


def _reference(x, y, params, bg=0.1):
    def lin(W, b, v):
        return jnp.dot(v, W.T, precision=_HIGHEST) + b

    r = jax.nn.sigmoid(lin(params["Wr"], params["br_w"], y)
                       + lin(params["Ur"], params["br_u"], x))
    z = jax.nn.sigmoid(lin(params["Wz"], params["bz_w"], y)
                       + lin(params["Uz"], params["bz_u"], x) - bg)
    h = jnp.tanh(lin(params["Wg"], params["bg_w"], y)
                 + lin(params["Ug"], params["bg_u"], r * x))
    return (1.0 - z) * x + z * h


if __name__ == "__main__":
    key = jax.random.PRNGKey(0)
    kp, kx, ky = jax.random.split(key, 3)

    seq, batch, d_input = 8, 2, 32
    params = init_gating_params(kp, d_input)
    x = jax.random.normal(kx, (seq, batch, d_input), dtype=jnp.float32)
    y = jax.random.normal(ky, (seq, batch, d_input), dtype=jnp.float32)

    out = gating_mechanism(x, y, params, bg=0.1)
    out = jax.block_until_ready(out)

    ref = _reference(x, y, params, bg=0.1)
    assert out.shape == x.shape, out.shape
    assert jnp.allclose(out, ref, atol=1e-4, rtol=1e-4), float(
        jnp.max(jnp.abs(out - ref)))

    print("KERNEL_OK")
</pallas_src>

<mosaic_0001>
module attributes {stable_mosaic.version = 11 : i64} {
  func.func @_gating_kernel(%arg0: i32, %arg1: memref<16x32xf32, #tpu.memory_space<vmem>>, %arg2: memref<16x32xf32, #tpu.memory_space<vmem>>, %arg3: memref<3x32x32xf32, #tpu.memory_space<vmem>>, %arg4: memref<3x32x32xf32, #tpu.memory_space<vmem>>, %arg5: memref<3x1x32xf32, #tpu.memory_space<vmem>>, %arg6: memref<3x1x32xf32, #tpu.memory_space<vmem>>, %arg7: memref<16x32xf32, #tpu.memory_space<vmem>>) attributes {dimension_semantics = [#tpu.dimension_semantics<parallel>], iteration_bounds = array<i64: 1>, scalar_prefetch = 0 : i64, scratch_operands = 0 : i64, tpu.core_type = #tpu.core_type<tc>, window_params = [{transform_indices = @transform_0, window_bounds = array<i64: 16, 32>}, {transform_indices = @transform_1, window_bounds = array<i64: 16, 32>}, {pipeline_mode = #tpu.pipeline_mode<synchronous>, transform_indices = @transform_2, window_bounds = array<i64: 3, 32, 32>}, {pipeline_mode = #tpu.pipeline_mode<synchronous>, transform_indices = @transform_3, window_bounds = array<i64: 3, 32, 32>}, {pipeline_mode = #tpu.pipeline_mode<synchronous>, transform_indices = @transform_4, window_bounds = array<i64: 3, 1, 32>}, {pipeline_mode = #tpu.pipeline_mode<synchronous>, transform_indices = @transform_5, window_bounds = array<i64: 3, 1, 32>}, {transform_indices = @transform_6, window_bounds = array<i64: 16, 32>}]} {
    %c0 = arith.constant 0 : index
    %c0_0 = arith.constant 0 : index
    %0 = vector.load %arg1[%c0, %c0_0] : memref<16x32xf32, #tpu.memory_space<vmem>>, vector<16x32xf32>
    %c0_1 = arith.constant 0 : index
    %c0_2 = arith.constant 0 : index
    %1 = vector.load %arg2[%c0_1, %c0_2] : memref<16x32xf32, #tpu.memory_space<vmem>>, vector<16x32xf32>
    %c0_3 = arith.constant 0 : index
    %c0_4 = arith.constant 0 : index
    %c0_5 = arith.constant 0 : index
    %2 = vector.load %arg3[%c0_3, %c0_4, %c0_5] : memref<3x32x32xf32, #tpu.memory_space<vmem>>, vector<1x32x32xf32>
    %3 = vector.shape_cast %2 : vector<1x32x32xf32> to vector<32x32xf32>
    %cst = arith.constant dense<0.000000e+00> : vector<16x32xf32>
    %4 = tpu.matmul %1, %3, %cst {dimension_numbers = #tpu.dot_dimension_numbers<[1], [0], [0], [1], [0, 0, 1, 1], [], []>, precision = #tpu.contract_precision<fp32>} : vector<16x32xf32>, vector<32x32xf32>, vector<16x32xf32> -> vector<16x32xf32>
    %c0_6 = arith.constant 0 : index
    %c0_7 = arith.constant 0 : index
    %c0_8 = arith.constant 0 : index
    %5 = vector.load %arg5[%c0_6, %c0_7, %c0_8] : memref<3x1x32xf32, #tpu.memory_space<vmem>>, vector<1x1x32xf32>
    %6 = vector.shape_cast %5 : vector<1x1x32xf32> to vector<1x32xf32>
    %7 = vector.broadcast %6 : vector<1x32xf32> to vector<16x32xf32>
    %8 = arith.addf %4, %7 : vector<16x32xf32>
    %c1 = arith.constant 1 : index
    %c0_9 = arith.constant 0 : index
    %c0_10 = arith.constant 0 : index
    %9 = vector.load %arg3[%c1, %c0_9, %c0_10] : memref<3x32x32xf32, #tpu.memory_space<vmem>>, vector<1x32x32xf32>
    %10 = vector.shape_cast %9 : vector<1x32x32xf32> to vector<32x32xf32>
    %cst_11 = arith.constant dense<0.000000e+00> : vector<16x32xf32>
    %11 = tpu.matmul %1, %10, %cst_11 {dimension_numbers = #tpu.dot_dimension_numbers<[1], [0], [0], [1], [0, 0, 1, 1], [], []>, precision = #tpu.contract_precision<fp32>} : vector<16x32xf32>, vector<32x32xf32>, vector<16x32xf32> -> vector<16x32xf32>
    %c1_12 = arith.constant 1 : index
    %c0_13 = arith.constant 0 : index
    %c0_14 = arith.constant 0 : index
    %12 = vector.load %arg5[%c1_12, %c0_13, %c0_14] : memref<3x1x32xf32, #tpu.memory_space<vmem>>, vector<1x1x32xf32>
    %13 = vector.shape_cast %12 : vector<1x1x32xf32> to vector<1x32xf32>
    %14 = vector.broadcast %13 : vector<1x32xf32> to vector<16x32xf32>
    %15 = arith.addf %11, %14 : vector<16x32xf32>
    %c2 = arith.constant 2 : index
    %c0_15 = arith.constant 0 : index
    %c0_16 = arith.constant 0 : index
    %16 = vector.load %arg3[%c2, %c0_15, %c0_16] : memref<3x32x32xf32, #tpu.memory_space<vmem>>, vector<1x32x32xf32>
    %17 = vector.shape_cast %16 : vector<1x32x32xf32> to vector<32x32xf32>
    %cst_17 = arith.constant dense<0.000000e+00> : vector<16x32xf32>
    %18 = tpu.matmul %1, %17, %cst_17 {dimension_numbers = #tpu.dot_dimension_numbers<[1], [0], [0], [1], [0, 0, 1, 1], [], []>, precision = #tpu.contract_precision<fp32>} : vector<16x32xf32>, vector<32x32xf32>, vector<16x32xf32> -> vector<16x32xf32>
    %c2_18 = arith.constant 2 : index
    %c0_19 = arith.constant 0 : index
    %c0_20 = arith.constant 0 : index
    %19 = vector.load %arg5[%c2_18, %c0_19, %c0_20] : memref<3x1x32xf32, #tpu.memory_space<vmem>>, vector<1x1x32xf32>
    %20 = vector.shape_cast %19 : vector<1x1x32xf32> to vector<1x32xf32>
    %21 = vector.broadcast %20 : vector<1x32xf32> to vector<16x32xf32>
    %22 = arith.addf %18, %21 : vector<16x32xf32>
    %c0_21 = arith.constant 0 : index
    %c0_22 = arith.constant 0 : index
    %c0_23 = arith.constant 0 : index
    %23 = vector.load %arg4[%c0_21, %c0_22, %c0_23] : memref<3x32x32xf32, #tpu.memory_space<vmem>>, vector<1x32x32xf32>
    %24 = vector.shape_cast %23 : vector<1x32x32xf32> to vector<32x32xf32>
    %cst_24 = arith.constant dense<0.000000e+00> : vector<16x32xf32>
    %25 = tpu.matmul %0, %24, %cst_24 {dimension_numbers = #tpu.dot_dimension_numbers<[1], [0], [0], [1], [0, 0, 1, 1], [], []>, precision = #tpu.contract_precision<fp32>} : vector<16x32xf32>, vector<32x32xf32>, vector<16x32xf32> -> vector<16x32xf32>
    %c0_25 = arith.constant 0 : index
    %c0_26 = arith.constant 0 : index
    %c0_27 = arith.constant 0 : index
    %26 = vector.load %arg6[%c0_25, %c0_26, %c0_27] : memref<3x1x32xf32, #tpu.memory_space<vmem>>, vector<1x1x32xf32>
    %27 = vector.shape_cast %26 : vector<1x1x32xf32> to vector<1x32xf32>
    %28 = vector.broadcast %27 : vector<1x32xf32> to vector<16x32xf32>
    %29 = arith.addf %25, %28 : vector<16x32xf32>
    %c1_28 = arith.constant 1 : index
    %c0_29 = arith.constant 0 : index
    %c0_30 = arith.constant 0 : index
    %30 = vector.load %arg4[%c1_28, %c0_29, %c0_30] : memref<3x32x32xf32, #tpu.memory_space<vmem>>, vector<1x32x32xf32>
    %31 = vector.shape_cast %30 : vector<1x32x32xf32> to vector<32x32xf32>
    %cst_31 = arith.constant dense<0.000000e+00> : vector<16x32xf32>
    %32 = tpu.matmul %0, %31, %cst_31 {dimension_numbers = #tpu.dot_dimension_numbers<[1], [0], [0], [1], [0, 0, 1, 1], [], []>, precision = #tpu.contract_precision<fp32>} : vector<16x32xf32>, vector<32x32xf32>, vector<16x32xf32> -> vector<16x32xf32>
    %c1_32 = arith.constant 1 : index
    %c0_33 = arith.constant 0 : index
    %c0_34 = arith.constant 0 : index
    %33 = vector.load %arg6[%c1_32, %c0_33, %c0_34] : memref<3x1x32xf32, #tpu.memory_space<vmem>>, vector<1x1x32xf32>
    %34 = vector.shape_cast %33 : vector<1x1x32xf32> to vector<1x32xf32>
    %35 = vector.broadcast %34 : vector<1x32xf32> to vector<16x32xf32>
    %36 = arith.addf %32, %35 : vector<16x32xf32>
    %37 = arith.addf %8, %29 : vector<16x32xf32>
    %38 = arith.negf %37 : vector<16x32xf32>
    %39 = math.exp %38 : vector<16x32xf32>
    %cst_35 = arith.constant 1.000000e+00 : f32
    %40 = vector.broadcast %cst_35 : f32 to vector<16x32xf32>
    %41 = arith.addf %40, %39 : vector<16x32xf32>
    %42 = arith.divf %40, %41 : vector<16x32xf32>
    %43 = arith.addf %15, %36 : vector<16x32xf32>
    %44 = arith.negf %43 : vector<16x32xf32>
    %45 = math.exp %44 : vector<16x32xf32>
    %cst_36 = arith.constant 1.000000e+00 : f32
    %46 = vector.broadcast %cst_36 : f32 to vector<16x32xf32>
    %47 = arith.addf %46, %45 : vector<16x32xf32>
    %48 = arith.divf %46, %47 : vector<16x32xf32>
    %49 = arith.mulf %42, %0 : vector<16x32xf32>
    %c2_37 = arith.constant 2 : index
    %c0_38 = arith.constant 0 : index
    %c0_39 = arith.constant 0 : index
    %50 = vector.load %arg4[%c2_37, %c0_38, %c0_39] : memref<3x32x32xf32, #tpu.memory_space<vmem>>, vector<1x32x32xf32>
    %51 = vector.shape_cast %50 : vector<1x32x32xf32> to vector<32x32xf32>
    %cst_40 = arith.constant dense<0.000000e+00> : vector<16x32xf32>
    %52 = tpu.matmul %49, %51, %cst_40 {dimension_numbers = #tpu.dot_dimension_numbers<[1], [0], [0], [1], [0, 0, 1, 1], [], []>, precision = #tpu.contract_precision<fp32>} : vector<16x32xf32>, vector<32x32xf32>, vector<16x32xf32> -> vector<16x32xf32>
    %c2_41 = arith.constant 2 : index
    %c0_42 = arith.constant 0 : index
    %c0_43 = arith.constant 0 : index
    %53 = vector.load %arg6[%c2_41, %c0_42, %c0_43] : memref<3x1x32xf32, #tpu.memory_space<vmem>>, vector<1x1x32xf32>
    %54 = vector.shape_cast %53 : vector<1x1x32xf32> to vector<1x32xf32>
    %55 = vector.broadcast %54 : vector<1x32xf32> to vector<16x32xf32>
    %56 = arith.addf %52, %55 : vector<16x32xf32>
    %57 = arith.addf %22, %56 : vector<16x32xf32>
    %58 = math.tanh %57 : vector<16x32xf32>
    %cst_44 = arith.constant 1.000000e+00 : f32
    %59 = vector.broadcast %cst_44 : f32 to vector<16x32xf32>
    %60 = arith.subf %59, %48 : vector<16x32xf32>
    %61 = arith.mulf %60, %0 : vector<16x32xf32>
    %62 = arith.mulf %48, %58 : vector<16x32xf32>
    %63 = arith.addf %61, %62 : vector<16x32xf32>
    %c0_45 = arith.constant 0 : index
    %c0_46 = arith.constant 0 : index
    %64 = vector.load %arg7[%c0_45, %c0_46] : memref<16x32xf32, #tpu.memory_space<vmem>>, vector<16x32xf32>
    tpu.vector_store %arg7[%c0_45, %c0_46], %63 {strides = array<i32>} : memref<16x32xf32, #tpu.memory_space<vmem>>, vector<16x32xf32>,
    return
  }
  func.func @transform_0(%arg0: i32) -> (i32, i32) {
    %c0_i32 = arith.constant 0 : i32
    %c0_i32_0 = arith.constant 0 : i32
    return %arg0, %c0_i32 : i32, i32
  }
  func.func @transform_1(%arg0: i32) -> (i32, i32) {
    %c0_i32 = arith.constant 0 : i32
    %c0_i32_0 = arith.constant 0 : i32
    return %arg0, %c0_i32 : i32, i32
  }
  func.func @transform_2(%arg0: i32) -> (i32, i32, i32) {
    %c0_i32 = arith.constant 0 : i32
    %c0_i32_0 = arith.constant 0 : i32
    %c0_i32_1 = arith.constant 0 : i32
    %c0_i32_2 = arith.constant 0 : i32
    return %c0_i32, %c0_i32_0, %c0_i32_1 : i32, i32, i32
  }
  func.func @transform_3(%arg0: i32) -> (i32, i32, i32) {
    %c0_i32 = arith.constant 0 : i32
    %c0_i32_0 = arith.constant 0 : i32
    %c0_i32_1 = arith.constant 0 : i32
    %c0_i32_2 = arith.constant 0 : i32
    return %c0_i32, %c0_i32_0, %c0_i32_1 : i32, i32, i32
  }
  func.func @transform_4(%arg0: i32) -> (i32, i32, i32) {
    %c0_i32 = arith.constant 0 : i32
    %c0_i32_0 = arith.constant 0 : i32
    %c0_i32_1 = arith.constant 0 : i32
    %c0_i32_2 = arith.constant 0 : i32
    return %c0_i32, %c0_i32_0, %c0_i32_1 : i32, i32, i32
  }
  func.func @transform_5(%arg0: i32) -> (i32, i32, i32) {
    %c0_i32 = arith.constant 0 : i32
    %c0_i32_0 = arith.constant 0 : i32
    %c0_i32_1 = arith.constant 0 : i32
    %c0_i32_2 = arith.constant 0 : i32
    return %c0_i32, %c0_i32_0, %c0_i32_1 : i32, i32, i32
  }
  func.func @transform_6(%arg0: i32) -> (i32, i32) {
    %c0_i32 = arith.constant 0 : i32
    %c0_i32_0 = arith.constant 0 : i32
    return %arg0, %c0_i32 : i32, i32
  }
}

</mosaic_0001>

<bundles_post_ra>
// kernel: tpu_custom_call.1
= control target key start
LH: loop header
LB: loop body
LE: loop exit
PB: predicated region body
PF: predicated region fallthrough
CT: control target
= control target key end

     0   :  { %11 = vsyncpa [#allocation3], 0  ;;  %s5072_s0 = inlined_call_operand.hbm [shape: f32[16,32], index: 0, kind: input, shape index: {}]   ;;  %s5073_s1 = inlined_call_operand.hbm [shape: f32[16,32], index: 1, kind: input, shape index: {}]   ;;  %s5074_s2 = inlined_call_operand.hbm [shape: f32[3,32,32], index: 2, kind: input, shape index: {}]   ;;  %s5075_s3 = inlined_call_operand.hbm [shape: f32[3,32,32], index: 3, kind: input, shape index: {}]   ;;  %s5076_s4 = inlined_call_operand.vmem [shape: f32[3,1,32], index: 4, kind: input, shape index: {}]   ;;  %s5077_s5 = inlined_call_operand.vmem [shape: f32[3,1,32], index: 5, kind: input, shape index: {}]   ;;  %s5078_s6 = inlined_call_operand.hbm [shape: f32[16,32], index: 6, kind: output, shape index: {}]  }
   0x1   :  { %12 = vsyncpa [#allocation6], 0 }
   0x2   :  { %13 = vsyncpa [#allocation9], 0 }
   0x3   :  { %14 = vsyncpa [#allocation4], 0  ;;  %s4544_s21 = smov [#allocation5]   ;;  %s4545_s23 = smov [#allocation2]  }
   0x4   :  { %s32_s22 = sshll.u32 %s4544_s21, 4  ;;  %s20_s24 = sshll.u32 %s4545_s23, 4  ;;  %s33_s22 = int_to_ptr.vmem [resolvable:$true] %s32_s22  ;;  %s4586_s24 = int_to_ptr.vmem [resolvable:$true] %s20_s24 }
   0x5   :  { %s4426_s27 = scalar_lea.hbm %s5073_s1, 256 }
   0x6   :  { %p4427_p0 = scmp.ne.s32.totalorder %s5073_s1, %s4426_s27  ;;  %p4430_p1 = scmp.lt.u32.totalorder %s4426_s27, %s5073_s1 }
   0x8   :  { %p4432_p2 = pnand %p4430_p1, %p4427_p0 }
   0xa   :  { %4435 = shalt.err (!%p4432_p2)
}
   0xb   :  { %s4436_s8 = scalar_lea.vmem %s33_s22, 256  ;;  %p4441_p4 = scmp.lt.s32.totalorder %s33_s22, %s33_s22 }
   0xc   :  { %p4437_p3 = scmp.ne.s32.totalorder %s33_s22, %s4436_s8  ;;  %p4442_p5 = scmp.lt.s32.totalorder %s4436_s8, %s4436_s8 }
   0xe   :  { %p4443_p6 = por %p4442_p5, %p4441_p4 }
  0x10   :  { %p4444_p7 = pnand %p4443_p6, %p4437_p3 }
  0x12   :  { %4447 = shalt.err (!%p4444_p7)
}
  0x13   :  { %s4546_s9 = smov 128   ;;  %s4547_s10 = smov 8  }
  0x14   :  { %38 = dma.hbm_to_vmem [thread:$0]  %s5073_s1, 256, %s33_s22, [#allocation6], %s4546_s9, %s4546_s9, %s4547_s10  }
  0x15   :  { %s4448_s15 = scalar_lea.hbm %s5072_s0, 256 }
  0x16   :  { %p4449_p8 = scmp.ne.s32.totalorder %s5072_s0, %s4448_s15  ;;  %p4452_p9 = scmp.lt.u32.totalorder %s4448_s15, %s5072_s0 }
  0x18   :  { %p4454_p10 = pnand %p4452_p9, %p4449_p8 }
  0x1a   :  { %4457 = shalt.err (!%p4454_p10)
}
  0x1b   :  { %s4458_s20 = scalar_lea.vmem %s4586_s24, 256  ;;  %p4463_p12 = scmp.lt.s32.totalorder %s4586_s24, %s4586_s24 }
  0x1c   :  { %p4459_p11 = scmp.ne.s32.totalorder %s4586_s24, %s4458_s20  ;;  %p4464_p13 = scmp.lt.s32.totalorder %s4458_s20, %s4458_s20 }
  0x1e   :  { %p4465_p0 = por %p4464_p13, %p4463_p12 }
  0x20   :  { %p4466_p1 = pnand %p4465_p0, %p4459_p11 }
  0x22   :  { %4469 = shalt.err (!%p4466_p1)
}
  0x23   :  { %26 = dma.hbm_to_vmem [thread:$0]  %s5072_s0, 256, %s4586_s24, [#allocation3], %s4546_s9, %s4546_s9, %s4547_s10  }
  0x24   :  { %s4548_s22 = smov [#allocation7]   ;;  %s4549_s25 = smov [#allocation8]  }
  0x25   :  { %s44_s23 = sshll.u32 %s4548_s22, 4  ;;  %s56_s26 = sshll.u32 %s4549_s25, 4  ;;  %s45_s23 = int_to_ptr.vmem [resolvable:$true] %s44_s23  ;;  %s4623_s26 = int_to_ptr.vmem [resolvable:$true] %s56_s26 }
  0x26   :  { %s4470_s29 = scalar_lea.hbm %s5074_s2, 1536 }
  0x27   :  { %p4471_p2 = scmp.ne.s32.totalorder %s5074_s2, %s4470_s29  ;;  %p4474_p3 = scmp.lt.u32.totalorder %s4470_s29, %s5074_s2 }
  0x29   :  { %p4476_p4 = pnand %p4474_p3, %p4471_p2 }
  0x2b   :  { %4479 = shalt.err (!%p4476_p4)
}
  0x2c   :  { %s4480_s0 = scalar_lea.vmem %s45_s23, 1536  ;;  %p4485_p6 = scmp.lt.s32.totalorder %s45_s23, %s45_s23 }
  0x2d   :  { %p4481_p5 = scmp.ne.s32.totalorder %s45_s23, %s4480_s0  ;;  %p4486_p7 = scmp.lt.s32.totalorder %s4480_s0, %s4480_s0 }
  0x2f   :  { %p4487_p8 = por %p4486_p7, %p4485_p6 }
  0x31   :  { %p4488_p9 = pnand %p4487_p8, %p4481_p5 }
  0x33   :  { %4491 = shalt.err (!%p4488_p9)
}
  0x34   :  { %50 = dma.hbm_to_vmem [thread:$0]  %s5074_s2, 1536, %s45_s23, [#allocation6], %s4546_s9, %s4546_s9, %s4547_s10  }
  0x35   :  { %s4492_s15 = scalar_lea.hbm %s5075_s3, 1536 }
  0x36   :  { %p4493_p10 = scmp.ne.s32.totalorder %s5075_s3, %s4492_s15  ;;  %p4496_p11 = scmp.lt.u32.totalorder %s4492_s15, %s5075_s3 }
  0x38   :  { %p4498_p12 = pnand %p4496_p11, %p4493_p10 }
  0x3a   :  { %4501 = shalt.err (!%p4498_p12)
}
  0x3b   :  { %s4502_s20 = scalar_lea.vmem %s4623_s26, 1536  ;;  %p4507_p0 = scmp.lt.s32.totalorder %s4623_s26, %s4623_s26 }
  0x3c   :  { %p4503_p13 = scmp.ne.s32.totalorder %s4623_s26, %s4502_s20  ;;  %p4508_p1 = scmp.lt.s32.totalorder %s4502_s20, %s4502_s20 }
  0x3e   :  { %p4509_p2 = por %p4508_p1, %p4507_p0 }
  0x40   :  { %p4510_p3 = pnand %p4509_p2, %p4503_p13 }
  0x42   :  { %4513 = shalt.err (!%p4510_p3)
}
  0x43   :  { %62 = dma.hbm_to_vmem [thread:$0]  %s5075_s3, 1536, %s4623_s26, [#allocation9], %s4546_s9, %s4546_s9, %s4547_s10  }
  0x44   :  { %4536 = dma.done.wait [#allocation3], 256  }
  0x45   :  { %4537 = vsyncadd [#allocation3], 4294967040 }
  0x46   :  { %4538 = dma.done.wait [#allocation6], 1792  }
  0x47   :  { %4539 = vsyncadd [#allocation6], 4294965504 }
  0x48   :  { %4540 = dma.done.wait [#allocation9], 1536  }
  0x49   :  { %4541 = vsyncadd [#allocation9], 4294965760  ;;  %v1171_v0 = vld [vmem:[#allocation7 + $0x40] sm:$0xff]  ;;  %v1172_v1 = vld [vmem:[#allocation7 + $0x48] sm:$0xff]  ;;  %vm94_vm0 = vcmask 261120  }
  0x4a   :  { %v83_v2 = vld [vmem:[#allocation7] sm:$0xff]  ;;  %v1184_v3 = vand.u32 4294901760, %v1171_v0  ;;  %v1187_v4 = vand.u32 4294901760, %v1172_v1  ;;  %v84_v5 = vld [vmem:[#allocation7 + $0x8] sm:$0xff]  ;;  %v1173_v7 = vld [vmem:[#allocation7 + $0x50] sm:$0xff] }
  0x4b   :  { %v102_v6 = vand.u32 4294901760, %v83_v2  ;;  %v1174_v8 = vld [vmem:[#allocation7 + $0x58] sm:$0xff]  ;;  %v105_v9 = vand.u32 4294901760, %v84_v5  ;;  %v1190_v10 = vand.u32 4294901760, %v1173_v7  ;;  %v85_v12 = vld [vmem:[#allocation7 + $0x10] sm:$0xff] }
  0x4c   :  { %v1193_v11 = vand.u32 4294901760, %v1174_v8  ;;  %v86_v13 = vld [vmem:[#allocation7 + $0x18] sm:$0xff]  ;;  %v81_v14 = vld [vmem:[#allocation5] sm:$0xff]  ;;  %v4660_v15 = vpack.c.bf16 %v1187_v4, %v1184_v3  ;;  %v108_v16 = vand.u32 4294901760, %v85_v12  ;;  %v4669_v23 = vsub.f32 %v1171_v0, %v1184_v3 }
  0x4d   :  { %v111_v17 = vand.u32 4294901760, %v86_v13  ;;  %v96_v18 = vsel %vm94_vm0, %v81_v14, 0  ;;  %v82_v19 = vld [vmem:[#allocation5 + $0x8] sm:$0xff]  ;;  %v4663_v20 = vpack.c.bf16 %v105_v9, %v102_v6  ;;  %v4674_v25 = vsub.f32 %v1172_v1, %v1187_v4  ;;  %v4785_v14 = vld [vmem:[#allocation8 + $0x8] sm:$0xff] }
  0x4e   :  { %v4665_v21 = vpack.c.bf16 %v1193_v11, %v1190_v10  ;;  %v4667_v22 = vand.u32 4294901760, %v96_v18  ;;  %4130 = vmatprep.subr.bf16.mxu0 %v4660_v15  ;;  %v99_v26 = vsel %vm94_vm0, %v82_v19, 0  ;;  %v4677_v27 = vsub.f32 %v83_v2, %v102_v6  ;;  %v1714_v19 = vld [vmem:[#allocation8 + $0x18] sm:$0xff] }
  0x4f   :  { %v4672_v24 = vpack.c.bf16 %v111_v17, %v108_v16  ;;  %4132 = vmatpush3.bf16.msra.mxu0 %v4660_v15  ;;  %4034 = vmatprep.subr.bf16.mxu1 %v4663_v20  ;;  %v1275_v29 = vand.u32 4294901760, %v4669_v23  ;;  %v4685_v30 = vand.u32 4294901760, %v99_v26  ;;  %v4687_v31 = vsub.f32 %v84_v5, %v105_v9 }
  0x50   :  { %v4682_v28 = vsub.f32 %v96_v18, %v4667_v22  ;;  %4134 = vmatprep.subr.bf16.mxu0 %v4665_v21  ;;  %4036 = vmatpush3.bf16.msra.mxu1 %v4663_v20  ;;  %v1282_v32 = vand.u32 4294901760, %v4674_v25  ;;  %v193_v33 = vand.u32 4294901760, %v4677_v27  ;;  %v4693_v34 = vsub.f32 %v1173_v7, %v1190_v10  ;;  %v4769_v10 = vld [vmem:[#allocation2] sm:$0xff]  ;;  %v4796_v18 = vld [vmem:[#allocation8 + $0x10] sm:$0xff] }
  0x51   :  { %v4695_v35 = vsub.f32 %v1174_v8, %v1193_v11  ;;  %4038 = vmatprep.subr.bf16.mxu1 %v4672_v24  ;;  %v1276_v37 = vsub.f32 %v4669_v23, %v1275_v29  ;;  %v4705_v38 = vsub.f32 %v99_v26, %v4685_v30  ;;  %v200_v39 = vand.u32 4294901760, %v4687_v31  ;;  %v4774_v11 = vld [vmem:[#allocation8] sm:$0xff] }
  0x52   :  { %v4699_v36 = vand.u32 4294901760, %v4682_v28  ;;  %v1283_v40 = vsub.f32 %v4674_v25, %v1282_v32  ;;  %v194_v41 = vsub.f32 %v4677_v27, %v193_v33  ;;  %v1289_v42 = vand.u32 4294901760, %v4693_v34 }
  0x53   :  { %v1296_v43 = vand.u32 4294901760, %v4695_v35  ;;  %4136 = vmatpush3.bf16.msra.mxu0 %v4665_v21  ;;  %v1277_v45 = vand.u32 4294901760, %v1276_v37  ;;  %v4720_v46 = vand.u32 4294901760, %v4705_v38  ;;  %v201_v47 = vsub.f32 %v4687_v31, %v200_v39 }
  0x54   :  { %v173_v44 = vsub.f32 %v4682_v28, %v4699_v36  ;;  %v1284_v48 = vand.u32 4294901760, %v1283_v40  ;;  %4040 = vmatpush3.bf16.msra.mxu1 %v4672_v24  ;;  %v195_v49 = vand.u32 4294901760, %v194_v41  ;;  %v1290_v50 = vsub.f32 %v4693_v34, %v1289_v42 }
  0x55   :  { %v1297_v51 = vsub.f32 %v4695_v35, %v1296_v43  ;;  %v183_v53 = vsub.f32 %v4705_v38, %v4720_v46  ;;  %v202_v54 = vand.u32 4294901760, %v201_v47  ;;  %v4736_v55 = vsub.f32 %v85_v12, %v108_v16 }
  0x56   :  { %v4732_v52 = vand.u32 4294901760, %v173_v44  ;;  %v4137_v56 = vpack.c.bf16 %v1284_v48, %v1277_v45  ;;  %v1291_v57 = vand.u32 4294901760, %v1290_v50  ;;  %v4738_v59 = vsub.f32 %v86_v13, %v111_v17  ;;  %v633_v44 = vld [vmem:[#allocation7 + $0x38] sm:$0xff] }
  0x57   :  { %v1298_v58 = vand.u32 4294901760, %v1297_v51  ;;  %v4741_v60 = vand.u32 4294901760, %v183_v53  ;;  %v4041_v61 = vpack.c.bf16 %v202_v54, %v195_v49  ;;  %v207_v62 = vand.u32 4294901760, %v4736_v55 }
  0x58   :  { %3777 = vmatprep.mubr.f32.mxu0 %v4732_v52  ;;  %3645 = vmatprep.mubr.f32.mxu1 %v4732_v52  ;;  %v214_v0 = vand.u32 4294901760, %v4738_v59  ;;  %v4145_v4 = vpack.c.bf16 %v4674_v25, %v4669_v23  ;;  %v4049_v7 = vpack.c.bf16 %v4687_v31, %v4677_v27  ;;  %v4149_v8 = vpack.c.bf16 %v4695_v35, %v4693_v34  ;;  %v4809_v27 = vld [vmem:[#allocation7 + $0x28] sm:$0xff] }
  0x59   :  { %4138 = vmatprep.subr.bf16.mxu0 %v4137_v56  ;;  %v4141_v63 = vpack.c.bf16 %v1298_v58, %v1291_v57  ;;  %3778 = vmatmul.mubr.f32.vlgmr.msra.gmra.mrb[0].mxu0 %v4741_v60  ;;  %v208_v1 = vsub.f32 %v4736_v55, %v207_v62  ;;  %v4053_v9 = vpack.c.bf16 %v4738_v59, %v4736_v55  ;;  %v1723_v13 = vsel %vm94_vm0, %v4769_v10, 0 }
  0x5a   :  { %3646 = vmatmul.mubr.f32.vlgmr.msra.gmra.mrb[0].mxu1 %v4741_v60  ;;  %4140 = vmatpush3.bf16.msra.mxu0 %v4137_v56  ;;  %v215_v2 = vsub.f32 %v4738_v59, %v214_v0  ;;  %v4161_v12 = vpack.c.bf16 %v1282_v32, %v1275_v29  ;;  %v1729_v16 = vand.u32 4294901760, %v4774_v11  ;;  %v4065_v17 = vpack.c.bf16 %v200_v39, %v193_v33  ;;  %v4805_v29 = vld [vmem:[#allocation2 + $0x8] sm:$0xff]  ;;  %v4807_v32 = vld [vmem:[#allocation7 + $0x20] sm:$0xff] }
  0x5b   :  { %4042 = vmatprep.subr.bf16.mxu1 %v4041_v61  ;;  %4142 = vmatprep.subr.bf16.mxu0 %v4141_v63  ;;  %v209_v3 = vand.u32 4294901760, %v208_v1  ;;  %v4798_v23 = vand.u32 4294901760, %v1723_v13  ;;  %v4165_v25 = vpack.c.bf16 %v1296_v43, %v1289_v42  ;;  %v1732_v26 = vand.u32 4294901760, %v4785_v14  ;;  %v632_v43 = vld [vmem:[#allocation7 + $0x30] sm:$0xff] }
  0x5c   :  { %4044 = vmatpush3.bf16.msra.mxu1 %v4041_v61  ;;  %v216_v5 = vand.u32 4294901760, %v215_v2  ;;  %3788 = vmatprep.mubr.f32.mxu0 %v4667_v22  ;;  %v1735_v31 = vand.u32 4294901760, %v4796_v18  ;;  %v1738_v33 = vand.u32 4294901760, %v1714_v19  ;;  %v4815_v34 = vsub.f32 %v4774_v11, %v1729_v16 }
  0x5d   :  { %3656 = vmatprep.mubr.f32.mxu1 %v4667_v22  ;;  %v4069_v35 = vpack.c.bf16 %v214_v0, %v207_v62  ;;  %v4822_v37 = vsub.f32 %v1723_v13, %v4798_v23  ;;  %v1726_v39 = vsel %vm94_vm0, %v4805_v29, 0  ;;  %v4828_v40 = vsub.f32 %v4785_v14, %v1732_v26 }
  0x5e   :  { %4144 = vmatpush3.bf16.msra.mxu0 %v4141_v63  ;;  %v4045_v6 = vpack.c.bf16 %v216_v5, %v209_v3  ;;  %v643_v41 = vand.u32 4294901760, %v4807_v32  ;;  %v646_v42 = vand.u32 4294901760, %v4809_v27  ;;  %v4834_v45 = vand.u32 4294901760, %v1726_v39 }
  0x5f   :  { %4146 = vmatprep.subr.bf16.mxu0 %v4145_v4  ;;  %v1820_v47 = vand.u32 4294901760, %v4815_v34  ;;  %v4838_v48 = vsub.f32 %v4796_v18, %v1735_v31  ;;  %v4840_v49 = vsub.f32 %v1714_v19, %v1738_v33  ;;  %v4843_v50 = vand.u32 4294901760, %v4822_v37 }
  0x60   :  { %4046 = vmatprep.subr.bf16.mxu1 %v4045_v6  ;;  %v649_v51 = vand.u32 4294901760, %v632_v43  ;;  %v652_v53 = vand.u32 4294901760, %v633_v44  ;;  %v1827_v54 = vand.u32 4294901760, %v4828_v40  ;;  %v4848_v55 = vsub.f32 %v4807_v32, %v643_v41 }
  0x61   :  { %4048 = vmatpush3.bf16.msra.mxu1 %v4045_v6  ;;  %3789 = vmatmul.mubr.f32.vlgmr.msra.gmra.mrb[0].mxu0 %v4685_v30  ;;  %v4851_v56 = vsub.f32 %v4809_v27, %v646_v42  ;;  %v4855_v57 = vsub.f32 %v1726_v39, %v4834_v45  ;;  %v1821_v58 = vsub.f32 %v4815_v34, %v1820_v47  ;;  %v1834_v59 = vand.u32 4294901760, %v4838_v48 }
  0x62   :  { %4148 = vmatpush3.bf16.msra.mxu0 %v4145_v4  ;;  %4050 = vmatprep.subr.bf16.mxu1 %v4049_v7  ;;  %v1841_v61 = vand.u32 4294901760, %v4840_v49  ;;  %v1800_v62 = vsub.f32 %v4822_v37, %v4843_v50  ;;  %v4866_v63 = vsub.f32 %v632_v43, %v649_v51  ;;  %v4868_v0 = vsub.f32 %v633_v44, %v652_v53 }
  0x63   :  { %4150 = vmatprep.subr.bf16.mxu0 %v4149_v8  ;;  %3799 = vmatprep.mubr.f32.mxu0 %v4682_v28  ;;  %v4872_v1 = vpack.c.bf16 %v1732_v26, %v1729_v16  ;;  %v1828_v2 = vsub.f32 %v4828_v40, %v1827_v54  ;;  %v741_v3 = vand.u32 4294901760, %v4851_v56  ;;  %v4882_v4 = vpack.c.bf16 %v1738_v33, %v1735_v31 }
  0x64   :  { %3657 = vmatmul.mubr.f32.vlgmr.msra.gmra.mrb[0].mxu1 %v4685_v30  ;;  %v4885_v5 = vand.u32 4294901760, %v4855_v57  ;;  %v1835_v6 = vsub.f32 %v4838_v48, %v1834_v59  ;;  %v755_v11 = vand.u32 4294901760, %v4868_v0  ;;  %v4900_v13 = vpack.c.bf16 %v646_v42, %v643_v41 }
  0x65   :  { %4052 = vmatpush3.bf16.msra.mxu1 %v4049_v7  ;;  %3667 = vmatprep.mubr.f32.mxu1 %v4682_v28  ;;  %v1842_v7 = vsub.f32 %v4840_v49, %v1841_v61  ;;  %v4914_v18 = vpack.c.bf16 %v652_v53, %v649_v51  ;;  %v4197_v43 = vpack.c.bf16 %v4840_v49, %v4838_v48  ;;  %v2259_v49 = vld [vmem:[#allocation8 + $0x30] sm:$0xff]  ;;  %v2260_v53 = vld [vmem:[#allocation8 + $0x38] sm:$0xff] }
  0x66   :  { %4152 = vmatpush3.bf16.msra.mxu0 %v4149_v8  ;;  %4054 = vmatprep.subr.bf16.mxu1 %v4053_v9  ;;  %v1822_v8 = vand.u32 4294901760, %v1821_v58  ;;  %v1810_v16 = vsub.f32 %v4855_v57, %v4885_v5  ;;  %v4097_v44 = vpack.c.bf16 %v4851_v56, %v4848_v55  ;;  %v4209_v51 = vpack.c.bf16 %v1827_v54, %v1820_v47 }
  0x67   :  { %4154 = vmatprep.subr.bf16.mxu0 %v4660_v15  ;;  %v1843_v26 = vand.u32 4294901760, %v1842_v7  ;;  %v2276_v54 = vand.u32 4294901760, %v2259_v49 }
  0x68   :  { %v4925_v31 = vand.u32 4294901760, %v1810_v16  ;;  %v2831_v16 = vld [vmem:[#allocation8 + $0x58] sm:$0xff] }
  0x69   :  { %4056 = vmatpush3.bf16.msra.mxu1 %v4053_v9  ;;  %3800 = vmatmul.mubr.f32.vlgmr.msra.gmra.mrb[0].mxu0 %v4705_v38  ;;  %v748_v9 = vand.u32 4294901760, %v4866_v63 }
  0x6a   :  { %4156 = vmatpush3.bf16.msra.mxu0 %v4660_v15  ;;  %4058 = vmatprep.subr.bf16.mxu1 %v4663_v20 }
  0x6b   :  { %4158 = vmatprep.subr.bf16.mxu0 %v4665_v21  ;;  %3810 = vmatprep.mubr.f32.mxu0 %v4699_v36  ;;  %v749_v19 = vsub.f32 %v4866_v63, %v748_v9 }
  0x6c   :  { %3668 = vmatmul.mubr.f32.vlgmr.msra.gmra.mrb[0].mxu1 %v4705_v38 }
  0x6d   :  { %4060 = vmatpush3.bf16.msra.mxu1 %v4663_v20  ;;  %3678 = vmatprep.mubr.f32.mxu1 %v4699_v36  ;;  %v750_v33 = vand.u32 4294901760, %v749_v19 }
  0x6e   :  { %4160 = vmatpush3.bf16.msra.mxu0 %v4665_v21  ;;  %4062 = vmatprep.subr.bf16.mxu1 %v4672_v24 }
  0x6f   :  { %4162 = vmatprep.subr.bf16.mxu0 %v4161_v12 }
  0x71   :  { %4064 = vmatpush3.bf16.msra.mxu1 %v4672_v24  ;;  %3811 = vmatmul.mubr.f32.vlgmr.msra.gmra.mrb[0].mxu0 %v4720_v46 }
  0x72   :  { %4164 = vmatpush3.bf16.msra.mxu0 %v4161_v12  ;;  %4066 = vmatprep.subr.bf16.mxu1 %v4065_v17  ;;  %v1829_v12 = vand.u32 4294901760, %v1828_v2 }
  0x73   :  { %4166 = vmatprep.subr.bf16.mxu0 %v4165_v25  ;;  %3821 = vmatprep.mubr.f32.mxu0 %v4667_v22 }
  0x74   :  { %3679 = vmatmul.mubr.f32.vlgmr.msra.gmra.mrb[0].mxu1 %v4720_v46 }
  0x75   :  { %4068 = vmatpush3.bf16.msra.mxu1 %v4065_v17  ;;  %3689 = vmatprep.mubr.f32.mxu1 %v4667_v22  ;;  %v1836_v17 = vand.u32 4294901760, %v1835_v6 }
  0x76   :  { %4168 = vmatpush3.bf16.msra.mxu0 %v4165_v25  ;;  %4070 = vmatprep.subr.bf16.mxu1 %v4069_v35  ;;  %v4185_v25 = vpack.c.bf16 %v1829_v12, %v1822_v8 }
  0x77   :  { %4170 = vmatprep.subr.bf16.mxu0 %v4660_v15  ;;  %v4189_v39 = vpack.c.bf16 %v1843_v26, %v1836_v17 }
  0x79   :  { %4072 = vmatpush3.bf16.msra.mxu1 %v4069_v35  ;;  %3822 = vmatmul.mubr.f32.vlgmr.msra.gmra.mrb[0].mxu0 %v4685_v30 }
  0x7a   :  { %4172 = vmatpush3.bf16.msra.mxu0 %v4660_v15  ;;  %4074 = vmatprep.subr.bf16.mxu1 %v4663_v20  ;;  %v734_v15 = vand.u32 4294901760, %v4848_v55 }
  0x7b   :  { %4174 = vmatprep.subr.bf16.mxu0 %v4665_v21  ;;  %3832 = vmatprep.mubr.f32.mxu0 %v4667_v22 }
  0x7c   :  { %3690 = vmatmul.mubr.f32.vlgmr.msra.gmra.mrb[0].mxu1 %v4685_v30  ;;  %v735_v14 = vsub.f32 %v4848_v55, %v734_v15  ;;  %v2279_v55 = vand.u32 4294901760, %v2260_v53 }
  0x7d   :  { %4076 = vmatpush3.bf16.msra.mxu1 %v4663_v20  ;;  %3700 = vmatprep.mubr.f32.mxu1 %v4667_v22  ;;  %v4895_v20 = vand.u32 4294901760, %v1800_v62 }
  0x7e   :  { %4176 = vmatpush3.bf16.msra.mxu0 %v4665_v21  ;;  %4078 = vmatprep.subr.bf16.mxu1 %v4672_v24  ;;  %v742_v21 = vsub.f32 %v4851_v56, %v741_v3  ;;  %v736_v32 = vand.u32 4294901760, %v735_v14  ;;  %v2381_v62 = vsub.f32 %v2260_v53, %v2279_v55 }
  0x7f   :  { %4178 = vmatprep.subr.bf16.mxu0 %v4872_v1 }
  0x80   :  { %v743_v27 = vand.u32 4294901760, %v742_v21 }
  0x81   :  { %4080 = vmatpush3.bf16.msra.mxu1 %v4672_v24  ;;  %3833 = vmatmul.mubr.f32.vlgmr.msra.gmra.mrb[0].mxu0 %v4685_v30  ;;  %v756_v24 = vsub.f32 %v4868_v0, %v755_v11 }
  0x82   :  { %4180 = vmatpush3.bf16.msra.mxu0 %v4872_v1  ;;  %3843 = vmatprep.mubr.f32.mxu0 %v4895_v20  ;;  %v4089_v41 = vpack.c.bf16 %v743_v27, %v736_v32 }
  0x83   :  { %4182 = vmatprep.subr.bf16.mxu0 %v4882_v4  ;;  %4082 = vmatprep.subr.bf16.mxu1 %v4900_v13  ;;  %v757_v35 = vand.u32 4294901760, %v756_v24 }
  0x84   :  { %3701 = vmatmul.mubr.f32.vlgmr.msra.gmra.mrb[0].mxu1 %v4685_v30 }
  0x85   :  { %4084 = vmatpush3.bf16.msra.mxu1 %v4900_v13  ;;  %3711 = vmatprep.mubr.f32.mxu1 %v4732_v52  ;;  %v4093_v42 = vpack.c.bf16 %v757_v35, %v750_v33  ;;  %v4193_v52 = vpack.c.bf16 %v4828_v40, %v4815_v34  ;;  %v4113_v34 = vpack.c.bf16 %v741_v3, %v734_v15  ;;  %v2258_v40 = vld [vmem:[#allocation8 + $0x28] sm:$0xff]  ;;  %v2382_v15 = vand.u32 4294901760, %v2381_v62 }
  0x86   :  { %4184 = vmatpush3.bf16.msra.mxu0 %v4882_v4  ;;  %4086 = vmatprep.subr.bf16.mxu1 %v4914_v18  ;;  %v2273_v48 = vand.u32 4294901760, %v2258_v40  ;;  %v4229_v3 = vpack.c.bf16 %v2279_v55, %v2276_v54  ;;  %v3412_v55 = vld [vmem:[%s5077_s5] ss:$0 sm:$0xff] }
  0x87   :  { %4186 = vmatprep.subr.bf16.mxu0 %v4185_v25 }
  0x88   :  { %v2367_v58 = vsub.f32 %v2258_v40, %v2273_v48 }
  0x89   :  { %3844 = vmatmul.mubr.f32.vlgmr.msra.gmra.mrb[2].mxu0 %v4925_v31  ;;  %4088 = vmatpush3.bf16.msra.mxu1 %v4914_v18 }
  0x8a   :  { %4188 = vmatpush3.bf16.msra.mxu0 %v4185_v25  ;;  %3854 = vmatprep.mubr.f32.mxu0 %v4798_v23 }
  0x8b   :  { %4190 = vmatprep.subr.bf16.mxu0 %v4189_v39  ;;  %4090 = vmatprep.subr.bf16.mxu1 %v4089_v41 }
  0x8c   :  { %3712 = vmatmul.mubr.f32.vlgmr.msra.gmra.mrb[2].mxu1 %v4741_v60  ;;  %v4101_v60 = vpack.c.bf16 %v4868_v0, %v4866_v63 }
  0x8d   :  { %4092 = vmatpush3.bf16.msra.mxu1 %v4089_v41  ;;  %3722 = vmatprep.mubr.f32.mxu1 %v4667_v22 }
  0x8e   :  { %4192 = vmatpush3.bf16.msra.mxu0 %v4189_v39  ;;  %4094 = vmatprep.subr.bf16.mxu1 %v4093_v42 }
  0x8f   :  { %4194 = vmatprep.subr.bf16.mxu0 %v4193_v52 }
  0x91   :  { %3855 = vmatmul.mubr.f32.vlgmr.msra.gmra.mrb[2].mxu0 %v4834_v45  ;;  %4096 = vmatpush3.bf16.msra.mxu1 %v4093_v42 }
  0x92   :  { %4196 = vmatpush3.bf16.msra.mxu0 %v4193_v52  ;;  %3865 = vmatprep.mubr.f32.mxu0 %v4822_v37 }
  0x93   :  { %4198 = vmatprep.subr.bf16.mxu0 %v4197_v43  ;;  %4098 = vmatprep.subr.bf16.mxu1 %v4097_v44 }
  0x94   :  { %3723 = vmatmul.mubr.f32.vlgmr.msra.gmra.mrb[2].mxu1 %v4685_v30 }
  0x95   :  { %4100 = vmatpush3.bf16.msra.mxu1 %v4097_v44  ;;  %3733 = vmatprep.mubr.f32.mxu1 %v4682_v28  ;;  %v4213_v28 = vpack.c.bf16 %v1841_v61, %v1834_v59  ;;  %v2368_v59 = vand.u32 4294901760, %v2367_v58  ;;  %v2374_v61 = vsub.f32 %v2259_v49, %v2276_v54  ;;  %v3407_v49 = vld [vmem:[%s5076_s4] ss:$0 sm:$0xff] }
  0x96   :  { %4200 = vmatpush3.bf16.msra.mxu0 %v4197_v43  ;;  %4102 = vmatprep.subr.bf16.mxu1 %v4101_v60 }
  0x97   :  { %4202 = vmatprep.subr.bf16.mxu0 %v4872_v1  ;;  %v2375_v2 = vand.u32 4294901760, %v2374_v61 }
  0x99   :  { %3866 = vmatmul.mubr.f32.vlgmr.msra.gmra.mrb[2].mxu0 %v4855_v57  ;;  %4104 = vmatpush3.bf16.msra.mxu1 %v4101_v60  ;;  %v2376_v8 = vsub.f32 %v2374_v61, %v2375_v2  ;;  %v4261_v14 = vpack.c.bf16 %v2382_v15, %v2375_v2 }
  0x9a   :  { %4204 = vmatpush3.bf16.msra.mxu0 %v4872_v1  ;;  %3876 = vmatprep.mubr.f32.mxu0 %v4843_v50 }
  0x9b   :  { %4206 = vmatprep.subr.bf16.mxu0 %v4882_v4  ;;  %4106 = vmatprep.subr.bf16.mxu1 %v4900_v13 }
  0x9c   :  { %3734 = vmatmul.mubr.f32.vlgmr.msra.gmra.mrb[2].mxu1 %v4705_v38  ;;  %v2257_v38 = vld [vmem:[#allocation8 + $0x20] sm:$0xff] }
  0x9d   :  { %4108 = vmatpush3.bf16.msra.mxu1 %v4900_v13  ;;  %3744 = vmatprep.mubr.f32.mxu1 %v4699_v36  ;;  %v4117_v36 = vpack.c.bf16 %v755_v11, %v748_v9  ;;  %v2270_v47 = vand.u32 4294901760, %v2257_v38  ;;  %v2377_v9 = vand.u32 4294901760, %v2376_v8 }
  0x9e   :  { %4208 = vmatpush3.bf16.msra.mxu0 %v4882_v4  ;;  %4110 = vmatprep.subr.bf16.mxu1 %v4914_v18 }
  0x9f   :  { %4210 = vmatprep.subr.bf16.mxu0 %v4209_v51  ;;  %v4980_v56 = vsub.f32 %v2257_v38, %v2270_v47  ;;  %v4225_v63 = vpack.c.bf16 %v2273_v48, %v2270_v47 }
  0xa1   :  { %3877 = vmatmul.mubr.f32.vlgmr.msra.gmra.mrb[2].mxu0 %v4885_v5  ;;  %4112 = vmatpush3.bf16.msra.mxu1 %v4914_v18 }
  0xa2   :  { %4212 = vmatpush3.bf16.msra.mxu0 %v4209_v51  ;;  %3887 = vmatprep.mubr.f32.mxu0 %v4798_v23 }
  0xa3   :  { %4214 = vmatprep.subr.bf16.mxu0 %v4213_v28  ;;  %4114 = vmatprep.subr.bf16.mxu1 %v4113_v34 }
  0xa4   :  { %3745 = vmatmul.mubr.f32.vlgmr.msra.gmra.mrb[2].mxu1 %v4720_v46  ;;  %v2361_v46 = vand.u32 4294901760, %v4980_v56 }
  0xa5   :  { %4116 = vmatpush3.bf16.msra.mxu1 %v4113_v34  ;;  %3755 = vmatprep.mubr.f32.mxu1 %v4667_v22 }
  0xa6   :  { %4216 = vmatpush3.bf16.msra.mxu0 %v4213_v28  ;;  %4118 = vmatprep.subr.bf16.mxu1 %v4117_v36  ;;  %v2362_v0 = vsub.f32 %v4980_v56, %v2361_v46 }
  0xa7   :  { %4218 = vmatprep.subr.bf16.mxu0 %v4872_v1 }
  0xa8   :  { %v2363_v6 = vand.u32 4294901760, %v2362_v0 }
  0xa9   :  { %3888 = vmatmul.mubr.f32.vlgmr.msra.gmra.mrb[2].mxu0 %v4834_v45  ;;  %4120 = vmatpush3.bf16.msra.mxu1 %v4117_v36 }
  0xaa   :  { %4220 = vmatpush3.bf16.msra.mxu0 %v4872_v1  ;;  %3898 = vmatprep.mubr.f32.mxu0 %v4798_v23  ;;  %v2369_v1 = vsub.f32 %v2367_v58, %v2368_v59 }
  0xab   :  { %4222 = vmatprep.subr.bf16.mxu0 %v4882_v4  ;;  %4122 = vmatprep.subr.bf16.mxu1 %v4900_v13 }
  0xac   :  { %3756 = vmatmul.mubr.f32.vlgmr.msra.gmra.mrb[2].mxu1 %v4685_v30  ;;  %v2370_v7 = vand.u32 4294901760, %v2369_v1 }
  0xad   :  { %4124 = vmatpush3.bf16.msra.mxu1 %v4900_v13  ;;  %3766 = vmatprep.mubr.f32.mxu1 %v4667_v22  ;;  %v2383_v22 = vsub.f32 %v2381_v62, %v2382_v15  ;;  %v4241_v13 = vpack.c.bf16 %v2367_v58, %v4980_v56 }
  0xae   :  { %4224 = vmatpush3.bf16.msra.mxu0 %v4882_v4  ;;  %4126 = vmatprep.subr.bf16.mxu1 %v4914_v18  ;;  %v4233_v4 = vpack.c.bf16 %v2370_v7, %v2363_v6 }
  0xaf   :  { %v2384_v11 = vand.u32 4294901760, %v2383_v22 }
  0xb1   :  { %3899 = vmatmul.mubr.f32.vlgmr.msra.gmra.mrb[2].mxu0 %v4834_v45  ;;  %4128 = vmatpush3.bf16.msra.mxu1 %v4914_v18  ;;  %v4237_v12 = vpack.c.bf16 %v2384_v11, %v2377_v9  ;;  %v2856_v18 = vand.u32 4294901760, %v2831_v16 }
  0xb2   :  { %4226 = vmatprep.subr.bf16.mxu1 %v4225_v63 }
  0xb3   :  { %v2958_v33 = vsub.f32 %v2831_v16, %v2856_v18 }
  0xb4   :  { %3767 = vmatmul.mubr.f32.vlgmr.msra.gmra.mrb[2].mxu1 %v4685_v30  ;;  %v4245_v30 = vpack.c.bf16 %v2381_v62, %v2374_v61 }
  0xb5   :  { %4228 = vmatpush3.bf16.msra.mxu1 %v4225_v63  ;;  %3909 = vmatprep.mubr.f32.mxu1 %v4895_v20  ;;  %v4257_v20 = vpack.c.bf16 %v2368_v59, %v2361_v46  ;;  %v2959_v42 = vand.u32 4294901760, %v2958_v33 }
  0xb6   :  { %4230 = vmatprep.subr.bf16.mxu1 %v4229_v3 }
  0xb7   :  { %v2960_v44 = vsub.f32 %v2958_v33, %v2959_v42 }
  0xb9   :  { %4232 = vmatpush3.bf16.msra.mxu1 %v4229_v3  ;;  %v2961_v51 = vand.u32 4294901760, %v2960_v44 }
  0xba   :  { %4234 = vmatprep.subr.bf16.mxu1 %v4233_v4 }
  0xbc   :  { %3910 = vmatmul.mubr.f32.vlgmr.msra.gmra.mrb[2].mxu1 %v4925_v31 }
  0xbd   :  { %4236 = vmatpush3.bf16.msra.mxu1 %v4233_v4  ;;  %3920 = vmatprep.mubr.f32.mxu1 %v4798_v23 }
  0xbe   :  { %4238 = vmatprep.subr.bf16.mxu1 %v4237_v12 }
  0xc1   :  { %4240 = vmatpush3.bf16.msra.mxu1 %v4237_v12 }
  0xc2   :  { %4242 = vmatprep.subr.bf16.mxu1 %v4241_v13 }
  0xc4   :  { %3921 = vmatmul.mubr.f32.vlgmr.msra.gmra.mrb[2].mxu1 %v4834_v45 }
  0xc5   :  { %4244 = vmatpush3.bf16.msra.mxu1 %v4241_v13  ;;  %3931 = vmatprep.mubr.f32.mxu1 %v4822_v37  ;;  %v2828_v37 = vld [vmem:[#allocation8 + $0x40] sm:$0xff] }
  0xc6   :  { %4246 = vmatprep.subr.bf16.mxu1 %v4245_v30 }
  0xc9   :  { %4248 = vmatpush3.bf16.msra.mxu1 %v4245_v30 }
  0xca   :  { %4250 = vmatprep.subr.bf16.mxu1 %v4225_v63 }
  0xcc   :  { %3932 = vmatmul.mubr.f32.vlgmr.msra.gmra.mrb[2].mxu1 %v4855_v57  ;;  %v2830_v57 = vld [vmem:[#allocation8 + $0x50] sm:$0xff] }
  0xcd   :  { %4252 = vmatpush3.bf16.msra.mxu1 %v4225_v63  ;;  %3942 = vmatprep.mubr.f32.mxu1 %v4843_v50  ;;  %v2829_v50 = vld [vmem:[#allocation8 + $0x48] sm:$0xff]  ;;  %v2853_v17 = vand.u32 4294901760, %v2830_v57 }
  0xce   :  { %4254 = vmatprep.subr.bf16.mxu1 %v4229_v3  ;;  %v2850_v21 = vand.u32 4294901760, %v2829_v50 }
  0xcf   :  { %v5013_v24 = vpack.c.bf16 %v2856_v18, %v2853_v17  ;;  %v2951_v31 = vsub.f32 %v2830_v57, %v2853_v17  ;;  %v3409_v17 = vld [vmem:[%s5076_s4 + $0x1] ss:$0 sm:$0xff] }
  0xd0   :  { %v3414_v18 = vld [vmem:[%s5077_s5 + $0x1] ss:$0 sm:$0xff] }
  0xd1   :  { %4256 = vmatpush3.bf16.msra.mxu1 %v4229_v3  ;;  %v2952_v41 = vand.u32 4294901760, %v2951_v31  ;;  %v4293_v38 = vpack.c.bf16 %v2958_v33, %v2951_v31  ;;  %v3411_v33 = vld [vmem:[%s5076_s4 + $0x2] ss:$0 sm:$0xff]  ;;  %s4550_s4 = smov [#allocation10]  }
  0xd2   :  { %4258 = vmatprep.subr.bf16.mxu1 %v4257_v20 }
  0xd3   :  { %v2953_v43 = vsub.f32 %v2951_v31, %v2952_v41  ;;  %v5019_v36 = vpack.c.bf16 %v2959_v42, %v2952_v41 }
  0xd4   :  { %3943 = vmatmul.mubr.f32.vlgmr.msra.gmra.mrb[2].mxu1 %v4885_v5  ;;  %v2847_v5 = vand.u32 4294901760, %v2828_v37 }
  0xd5   :  { %3953 = vmatprep.mubr.f32.mxu1 %v4798_v23  ;;  %4260 = vmatpush3.bf16.msra.mxu1 %v4257_v20  ;;  %v2954_v60 = vand.u32 4294901760, %v2953_v43 }
  0xd6   :  { %4262 = vmatprep.subr.bf16.mxu1 %v4261_v14  ;;  %v5011_v19 = vpack.c.bf16 %v2850_v21, %v2847_v5 }
  0xd7   :  { %v4285_v28 = vpack.c.bf16 %v2961_v51, %v2954_v60 }
  0xd8   :  { %4274 = vmatprep.subr.bf16.mxu0 %v5011_v19 }
  0xd9   :  { %4264 = vmatpush3.bf16.msra.mxu1 %v4261_v14  ;;  %4276 = vmatpush3.bf16.msra.mxu0 %v5011_v19 }
  0xda   :  { %4266 = vmatprep.subr.bf16.mxu1 %v4225_v63  ;;  %4278 = vmatprep.subr.bf16.mxu0 %v5013_v24 }
  0xdc   :  { %3954 = vmatmul.mubr.f32.vlgmr.msra.gmra.mrb[2].mxu1 %v4834_v45 }
  0xdd   :  { %4268 = vmatpush3.bf16.msra.mxu1 %v4225_v63  ;;  %3964 = vmatprep.mubr.f32.mxu1 %v4798_v23  ;;  %v2937_v23 = vsub.f32 %v2828_v37, %v2847_v5 }
  0xde   :  { %4270 = vmatprep.subr.bf16.mxu1 %v4229_v3  ;;  %4280 = vmatpush3.bf16.msra.mxu0 %v5013_v24 }
  0xdf   :  { %v2938_v25 = vand.u32 4294901760, %v2937_v23 }
  0xe1   :  { %4272 = vmatpush3.bf16.msra.mxu1 %v4229_v3  ;;  %v2939_v32 = vsub.f32 %v2937_v23, %v2938_v25 }
  0xe3   :  { %v2940_v35 = vand.u32 4294901760, %v2939_v32 }
  0xe4   :  { %3965 = vmatmul.mubr.f32.vlgmr.msra.gmra.mrb[2].mxu1 %v4834_v45  ;;  %v2944_v45 = vsub.f32 %v2829_v50, %v2850_v21 }
  0xe6   :  { %v2945_v26 = vand.u32 4294901760, %v2944_v45  ;;  %v4289_v34 = vpack.c.bf16 %v2944_v45, %v2937_v23  ;;  %v4329_v23 = vadd.f32 %v3414_v18, %v3409_v17 }
  0xe8   :  { %v2946_v27 = vsub.f32 %v2944_v45, %v2945_v26  ;;  %v4305_v40 = vpack.c.bf16 %v2945_v26, %v2938_v25 }
  0xea   :  { %v2947_v39 = vand.u32 4294901760, %v2946_v27 }
  0xec   :  { %v4281_v52 = vpack.c.bf16 %v2947_v39, %v2940_v35  ;;  %v3420_v35 = vld [vmem:[%s5077_s5 + $0x2] ss:$0 sm:$0xff]  ;;  %s3393_s5 = sshll.u32 %s4550_s4, 4  ;;  %s3394_s5 = int_to_ptr.vmem [resolvable:$true] %s3393_s5 }
  0xed   :  { %v4333_v39 = vadd.f32 %v3420_v35, %v3411_v33  ;;  %s4514_s11 = scalar_lea.vmem %s3394_s5, 256  ;;  %p4519_p5 = scmp.lt.s32.totalorder %s3394_s5, %s3394_s5 }
  0xee   :  { %4282 = vmatprep.subr.bf16.mxu0 %v4281_v52  ;;  %p4515_p4 = scmp.ne.s32.totalorder %s3394_s5, %s4514_s11  ;;  %p4520_p6 = scmp.lt.s32.totalorder %s4514_s11, %s4514_s11 }
  0xf0   :  { %p4521_p7 = por %p4520_p6, %p4519_p5 }
  0xf2   :  { %p4522_p8 = pnand %p4521_p7, %p4515_p4 }
 0x157   :  { %v3702_v47 = vpop.f32.mrb[0].mxu1 }
 0x158   :  { %v619_v48 = vpop.f32.mrb[1].mxu1  ;;  %v4321_v53 = vadd.f32 %v3702_v47, %v3407_v49 }
 0x159   :  { %v4324_v54 = vadd.f32 %v3407_v49, %v619_v48 }
 0x15a   :  { %v4322_v56 = vadd.f32 %v4321_v53, %v3412_v55 }
 0x15b   :  { %v4325_v46 = vadd.f32 %v4324_v54, %v3412_v55 }
 0x184   :  { %v3900_v58 = vpop.f32.mrb[2].mxu0 }
 0x185   :  { %v4323_v59 = vadd.f32 %v4322_v56, %v3900_v58  ;;  %v2246_v61 = vpop.f32.mrb[3].mxu0 }
 0x186   :  { %v4326_v62 = vadd.f32 %v4325_v46, %v2246_v61 }
 0x187   :  { %v3416_v63 = vmul.f32 -1.442695, %v4323_v59 }
 0x188   :  { %v3415_v0 = vmul.f32 -1.442695, %v4326_v62 }
 0x189   :  { %4406 = vpow2.f32 %v3416_v63 }
 0x18a   :  { %4408 = vpow2.f32 %v3415_v0 }
 0x193   :  { %v4407_v1 = vpop.eup %4406 }
 0x194   :  { %v4409_v2 = vpop.eup %4408  ;;  %v2806_v15 = vadd.f32 1.0, %v4407_v1 }
 0x195   :  { %v2805_v3 = vadd.f32 1.0, %v4409_v2 }
 0x196   :  { %4410 = vrcp.f32 %v2806_v15 }
 0x197   :  { %4412 = vrcp.f32 %v2805_v3 }
 0x1a0   :  { %v4411_v6 = vpop.eup %4410 }
 0x1a1   :  { %v4413_v7 = vpop.eup %4412  ;;  %v2826_v8 = vmul.f32 %v4411_v6, %v4805_v29 }
 0x1a2   :  { %v2825_v22 = vmul.f32 %v4413_v7, %v4769_v10 }
 0x1a3   :  { %v2844_v4 = vsel %vm94_vm0, %v2826_v8, 0 }
 0x1a4   :  { %v2841_v9 = vsel %vm94_vm0, %v2825_v22, 0  ;;  %v2925_v11 = vand.u32 4294901760, %v2844_v4 }
 0x1a5   :  { %v2915_v12 = vand.u32 4294901760, %v2841_v9 }
 0x1a6   :  { %v2926_v13 = vsub.f32 %v2844_v4, %v2925_v11 }
 0x1a7   :  { %v2916_v30 = vsub.f32 %v2841_v9, %v2915_v12 }
 0x1a8   :  { %v2927_v20 = vand.u32 4294901760, %v2926_v13 }
 0x1a9   :  { %v2917_v14 = vand.u32 4294901760, %v2916_v30 }
 0x1aa   :  { %v2928_v37 = vsub.f32 %v2926_v13, %v2927_v20 }
 0x1ab   :  { %v2918_v50 = vsub.f32 %v2916_v30, %v2917_v14 }
 0x1ac   :  { %v2929_v5 = vand.u32 4294901760, %v2928_v37 }
 0x1ad   :  { %v2919_v57 = vand.u32 4294901760, %v2918_v50 }
 0x1af   :  { %3975 = vmatprep.mubr.f32.mxu0 %v2919_v57 }
 0x1b0   :  { %3976 = vmatmul.mubr.f32.vlgmr.msra.gmra.mrb[0].mxu0 %v2929_v5 }
 0x1b1   :  { %4284 = vmatpush3.bf16.msra.mxu0 %v4281_v52  ;;  %3986 = vmatprep.mubr.f32.mxu0 %v2915_v12 }
 0x1b2   :  { %4286 = vmatprep.subr.bf16.mxu0 %v4285_v28 }
 0x1b5   :  { %4288 = vmatpush3.bf16.msra.mxu0 %v4285_v28 }
 0x1b6   :  { %4290 = vmatprep.subr.bf16.mxu0 %v4289_v34 }
 0x1b7   :  { %v3966_v21 = vpop.f32.mrb[2].mxu1 }
 0x1b8   :  { %3987 = vmatmul.mubr.f32.vlgmr.msra.gmra.mrb[0].mxu0 %v2925_v11  ;;  %v2787_v16 = vpop.f32.mrb[3].mxu1  ;;  %v4328_v45 = vadd.f32 %v4329_v23, %v3966_v21 }
 0x1b9   :  { %4292 = vmatpush3.bf16.msra.mxu0 %v4289_v34  ;;  %3997 = vmatprep.mubr.f32.mxu0 %v2916_v30  ;;  %v4330_v25 = vadd.f32 %v4329_v23, %v2787_v16 }
 0x1ba   :  { %4294 = vmatprep.subr.bf16.mxu0 %v4293_v38  ;;  %v3418_v26 = vmul.f32 -1.442695, %v4328_v45 }
 0x1bb   :  { %v3417_v32 = vmul.f32 -1.442695, %v4330_v25 }
 0x1bc   :  { %4414 = vpow2.f32 %v3418_v26 }
 0x1bd   :  { %4296 = vmatpush3.bf16.msra.mxu0 %v4293_v38  ;;  %4416 = vpow2.f32 %v3417_v32 }
 0x1be   :  { %4298 = vmatprep.subr.bf16.mxu0 %v5011_v19 }
 0x1c0   :  { %3998 = vmatmul.mubr.f32.vlgmr.msra.gmra.mrb[0].mxu0 %v2926_v13 }
 0x1c1   :  { %4300 = vmatpush3.bf16.msra.mxu0 %v5011_v19  ;;  %4008 = vmatprep.mubr.f32.mxu0 %v2917_v14 }
 0x1c2   :  { %4302 = vmatprep.subr.bf16.mxu0 %v5013_v24 }
 0x1c5   :  { %4304 = vmatpush3.bf16.msra.mxu0 %v5013_v24 }
 0x1c6   :  { %4306 = vmatprep.subr.bf16.mxu0 %v4305_v40 }
 0x1c8   :  { %4009 = vmatmul.mubr.f32.vlgmr.msra.gmra.mrb[0].mxu0 %v2927_v20 }
 0x1c9   :  { %4308 = vmatpush3.bf16.msra.mxu0 %v4305_v40  ;;  %4019 = vmatprep.mubr.f32.mxu0 %v2915_v12 }
 0x1ca   :  { %4310 = vmatprep.subr.bf16.mxu0 %v5019_v36 }
 0x1cd   :  { %4312 = vmatpush3.bf16.msra.mxu0 %v5019_v36 }
 0x1ce   :  { %4314 = vmatprep.subr.bf16.mxu0 %v5011_v19 }
 0x1d0   :  { %4020 = vmatmul.mubr.f32.vlgmr.msra.gmra.mrb[0].mxu0 %v2925_v11 }
 0x1d1   :  { %4316 = vmatpush3.bf16.msra.mxu0 %v5011_v19  ;;  %4030 = vmatprep.mubr.f32.mxu0 %v2915_v12  ;;  %v4415_v19 = vpop.eup %4414 }
 0x1d2   :  { %4318 = vmatprep.subr.bf16.mxu0 %v5013_v24  ;;  %v4417_v27 = vpop.eup %4416  ;;  %v2820_v31 = vadd.f32 1.0, %v4415_v19 }
 0x1d4   :  { %4418 = vrcp.f32 %v2820_v31 }
 0x1d5   :  { %4320 = vmatpush3.bf16.msra.mxu0 %v5013_v24  ;;  %v2819_v24 = vadd.f32 1.0, %v4417_v27 }
 0x1d7   :  { %4420 = vrcp.f32 %v2819_v24 }
 0x1d8   :  { %4031 = vmatmul.mubr.f32.vlgmr.msra.gmra.mrb[0].mxu0 %v2925_v11 }
 0x1de   :  { %v4419_v44 = vpop.eup %4418 }
 0x1df   :  { %v3379_v51 = vsub.f32 1.0, %v4419_v44 }
 0x1e1   :  { %v4421_v60 = vpop.eup %4420  ;;  %v3381_v40 = vmul.f32 %v3379_v51, %v4805_v29 }
 0x1e2   :  { %v3378_v28 = vsub.f32 1.0, %v4421_v60 }
 0x1e4   :  { %v3380_v47 = vmul.f32 %v3378_v28, %v4769_v10 }
 0x2ab   :  { %v4032_v41 = vpop.f32.mrb[0].mxu0 }
 0x2ac   :  { %v4332_v42 = vadd.f32 %v4333_v39, %v4032_v41  ;;  %v3364_v52 = vpop.f32.mrb[1].mxu0 }
 0x2ad   :  { %v4334_v43 = vadd.f32 %v4333_v39, %v3364_v52 }
 0x2ae   :  { %4422 = vtanh.f32 %v4332_v42 }
 0x2af   :  { %4424 = vtanh.f32 %v4334_v43 }
 0x2b8   :  { %v4423_v34 = vpop.eup %4422 }
 0x2b9   :  { %v4425_v38 = vpop.eup %4424  ;;  %v3383_v36 = vmul.f32 %v4423_v34, %v4419_v44 }
 0x2ba   :  { %v3382_v48 = vmul.f32 %v4425_v38, %v4421_v60 }
 0x2bb   :  { %v3385_v49 = vadd.f32 %v3383_v36, %v3381_v40 }
 0x2bc   :  { %v3384_v53 = vadd.f32 %v3382_v48, %v3380_v47 }
 0x2bd   :  { %3387 = vst.msk [vmem:[#allocation10 + $0x8] sm:$0xff] %vm94_vm0, %v3385_v49 }
 0x2be   :  { %3386 = vst.msk [vmem:[#allocation10] sm:$0xff] %vm94_vm0, %v3384_v53 }
 0x2bf   :  { %4525 = shalt.err (!%p4522_p8)
}
 0x2c0   :  { %s4526_s12 = scalar_lea.hbm %s5078_s6, 256 }
 0x2c1   :  { %p4527_p9 = scmp.ne.s32.totalorder %s5078_s6, %s4526_s12  ;;  %p4530_p10 = scmp.lt.u32.totalorder %s4526_s12, %s5078_s6 }
 0x2c3   :  { %p4532_p11 = pnand %p4530_p10, %p4527_p9 }
 0x2c5   :  { %4535 = shalt.err (!%p4532_p11)
}
 0x2c6   :  { %3399 = dma.vmem_to_hbm [thread:$0]  %s3394_s5, 256, %s5078_s6, [#allocation4], %s4546_s9, %s4546_s9, %s4547_s10  }
 0x2c7   :  { %4542 = dma.done.wait [#allocation4], 256  }
 0x2c8   :  { %4543 = vsyncadd [#allocation4], 4294967040 }
 0x2c9   :  { %3403 = vsyncpa [#allocation3], 1 }
 0x2ca   :  { %3404 = vsyncpa [#allocation6], 1 }
 0x2cb   :  { %3405 = vsyncpa [#allocation9], 1 }
 0x2cc   :  { %3406 = vsyncpa [#allocation4], 1 }

</bundles_post_ra>
